<compile_context>
chip_gen: v6e
topology: v6e:2x2x1
jax: 0.10.0
libtpu: 0.0.40
codegen_flags: <defaults>
</compile_context>

<pallas_src>
import jax
import jax.numpy as jnp
from jax.experimental import pallas as pl
from jax.experimental.pallas import tpu as pltpu


def _attention_kernel(inp_ref, src_ref, wi_ref, womix_ref, woin_ref,
                      out_ref, attn_ref):
    # inp_ref:   (BB, T, D_in)      one batch tile
    # src_ref:   (BB, S, D_src)
    # wi_ref:    (D_in, D_src)      loaded once (constant index_map)
    # womix_ref: (D_src, D_out)
    # woin_ref:  (D_in,  D_out)
    # out_ref:   (BB, T, D_out)
    # attn_ref:  (BB, T, S)
    bb, T, D_in = inp_ref.shape

    inp = inp_ref[...]
    src = src_ref[...]
    wi = wi_ref[...]
    wo_mix = womix_ref[...]
    wo_in = woin_ref[...]

    inp_flat = inp.reshape(bb * T, D_in)                     # fold batch tile into M

    # x = input_proj(input): single matmul with M = BB*T.
    x = jnp.dot(inp_flat, wi,
                preferred_element_type=jnp.float32).reshape(bb, T, -1)

    # attn logits = bmm(x, src^T): contract last dims directly (no .T temp).
    logits = jnp.einsum("btd,bsd->bts", x, src,
                        preferred_element_type=jnp.float32)  # (BB, T, S)

    # TODO(synk): optional user `mask` (masked_fill_ with -inf) not implemented;
    #             forward is assumed to be called with mask=None.

    # Numerically stable softmax over the source dimension.
    m = jnp.max(logits, axis=-1, keepdims=True)
    e = jnp.exp(logits - m)
    denom = jnp.sum(e, axis=-1, keepdims=True)
    # EUP vrcp (free VLIW slot) + one Newton step -> ~f32 accuracy w/o VALU divide.
    r = pl.reciprocal(denom, approx=True)
    r = r * (2.0 - denom * r)
    attn = e * r                                             # (BB, T, S)

    # mix = bmm(attn, src).
    mix = jnp.einsum("bts,bsd->btd", attn, src,
                     preferred_element_type=jnp.float32)     # (BB, T, D_src)

    # output = tanh(cat(mix, input) @ Wo) == tanh(mix @ Wo_mix + input @ Wo_in)
    # (split dots instead of a lane-axis concatenate), again with M = BB*T.
    out_flat = (jnp.dot(mix.reshape(bb * T, -1), wo_mix,
                        preferred_element_type=jnp.float32)
                + jnp.dot(inp_flat, wo_in,
                          preferred_element_type=jnp.float32))
    out = jnp.tanh(out_flat).reshape(bb, T, -1)              # (BB, T, D_out)

    out_ref[...] = out.astype(out_ref.dtype)
    attn_ref[...] = attn.astype(attn_ref.dtype)


def prepare_attention_params(wi_t, wo_t, source_dim):
    """One-time parameter preprocessing (hoisted out of the per-call path).

    Splits the output projection so the kernel never concatenates along the
    lane axis.  Call once at model-build time, not per forward.
    """
    wo_mix = jnp.asarray(wo_t[:source_dim])   # multiplies `mix`
    wo_in = jnp.asarray(wo_t[source_dim:])    # multiplies `input`
    return jnp.asarray(wi_t), wo_mix, wo_in


def attention_forward(inp, src, wi_t, wo_mix, wo_in, *, batch_block=None):
    B, T, D_in = inp.shape
    _, S, D_src = src.shape
    D_out = wo_mix.shape[1]

    if batch_block is None:
        # Two batch tiles by default (when B is even): gives both v7x
        # TensorCores work via "parallel" semantics while keeping the grid
        # short (cheap) on single-TC v5e/v6e.  For very large B pass a
        # smaller batch_block to bound per-step VMEM.
        batch_block = B // 2 if (B >= 2 and B % 2 == 0) else B
    assert B % batch_block == 0, "batch_block must divide batch size"
    n_blocks = B // batch_block

    out_shapes = (
        jax.ShapeDtypeStruct((B, T, D_out), inp.dtype),   # output
        jax.ShapeDtypeStruct((B, T, S), jnp.float32),     # attention weights
    )

    return pl.pallas_call(
        _attention_kernel,
        out_shape=out_shapes,
        grid_spec=pltpu.PrefetchScalarGridSpec(
            num_scalar_prefetch=0,
            grid=(n_blocks,),
            in_specs=[
                pl.BlockSpec((batch_block, T, D_in), lambda i: (i, 0, 0)),
                pl.BlockSpec((batch_block, S, D_src), lambda i: (i, 0, 0)),
                # Weights: constant block index -> fetched once, not per step.
                pl.BlockSpec((D_in, D_src), lambda i: (0, 0)),
                pl.BlockSpec((D_src, D_out), lambda i: (0, 0)),
                pl.BlockSpec((D_in, D_out), lambda i: (0, 0)),
            ],
            out_specs=[
                pl.BlockSpec((batch_block, T, D_out), lambda i: (i, 0, 0)),
                pl.BlockSpec((batch_block, T, S), lambda i: (i, 0, 0)),
            ],
        ),
        compiler_params=pltpu.CompilerParams(
            dimension_semantics=("parallel",),
            vmem_limit_bytes=32 * 1024 * 1024,
        ),
    )(inp, src, wi_t, wo_mix, wo_in)


def attention_reference(inp, src, wi_t, wo_t):
    # Pure-JAX reference mirroring the PyTorch forward.
    x = jnp.einsum("btd,de->bte", inp, wi_t)                # input_proj
    logits = jnp.einsum("bte,bse->bts", x, src)             # bmm(x, src^T)
    attn = jax.nn.softmax(logits, axis=-1)
    mix = jnp.einsum("bts,bse->bte", attn, src)             # bmm(attn, src)
    combined = jnp.concatenate([mix, inp], axis=-1)
    out = jnp.tanh(jnp.einsum("btc,co->bto", combined, wo_t))
    return out, attn


if __name__ == "__main__":
    # Small shapes consistent with the module's forward:
    B, T, S = 2, 8, 8
    input_dim = 32
    source_dim = 32   # defaults to input_dim in the module
    output_dim = 32   # defaults to input_dim in the module

    key = jax.random.PRNGKey(0)
    k1, k2, k3, k4 = jax.random.split(key, 4)

    inp = jax.random.normal(k1, (B, T, input_dim), dtype=jnp.float32)
    src = jax.random.normal(k2, (B, S, source_dim), dtype=jnp.float32)

    # Deterministic parameter init (Linear weights, bias=False), stored pre-transposed.
    # input_proj.weight:  (source_dim, input_dim)              -> Wi_t : (input_dim, source_dim)
    # output_proj.weight: (output_dim, input_dim + source_dim) -> Wo_t : (source_dim + input_dim, output_dim)
    wi_t = (jax.random.uniform(k3, (input_dim, source_dim), dtype=jnp.float32,
                               minval=-1.0, maxval=1.0) / jnp.sqrt(input_dim))
    wo_t = (jax.random.uniform(k4, (source_dim + input_dim, output_dim), dtype=jnp.float32,
                               minval=-1.0, maxval=1.0) / jnp.sqrt(input_dim + source_dim))

    # One-time parameter prep (hoisted out of the per-call path).
    wi_p, wo_mix, wo_in = prepare_attention_params(wi_t, wo_t, source_dim)
    wi_p, wo_mix, wo_in = jax.block_until_ready((wi_p, wo_mix, wo_in))

    out, attn = attention_forward(inp, src, wi_p, wo_mix, wo_in)
    out = jax.block_until_ready(out)
    attn = jax.block_until_ready(attn)

    out_ref, attn_ref = attention_reference(inp, src, wi_t, wo_t)

    assert out.shape == (B, T, output_dim)
    assert attn.shape == (B, T, S)
    assert jnp.allclose(out, out_ref, atol=1e-5, rtol=1e-4)
    assert jnp.allclose(attn, attn_ref, atol=1e-5, rtol=1e-4)

    print("KERNEL_OK")
</pallas_src>

<mosaic_0001>
module attributes {stable_mosaic.version = 11 : i64} {
  func.func @_attention_kernel(%arg0: i32, %arg1: memref<1x8x32xf32, #tpu.memory_space<vmem>>, %arg2: memref<1x8x32xf32, #tpu.memory_space<vmem>>, %arg3: memref<32x32xf32, #tpu.memory_space<vmem>>, %arg4: memref<32x32xf32, #tpu.memory_space<vmem>>, %arg5: memref<32x32xf32, #tpu.memory_space<vmem>>, %arg6: memref<1x8x32xf32, #tpu.memory_space<vmem>>, %arg7: memref<1x8x8xf32, #tpu.memory_space<vmem>>) attributes {dimension_semantics = [#tpu.dimension_semantics<parallel>], iteration_bounds = array<i64: 2>, scalar_prefetch = 0 : i64, scratch_operands = 0 : i64, tpu.core_type = #tpu.core_type<tc>, window_params = [{transform_indices = @transform_0, window_bounds = array<i64: 1, 8, 32>}, {transform_indices = @transform_1, window_bounds = array<i64: 1, 8, 32>}, {pipeline_mode = #tpu.pipeline_mode<synchronous>, transform_indices = @transform_2, window_bounds = array<i64: 32, 32>}, {pipeline_mode = #tpu.pipeline_mode<synchronous>, transform_indices = @transform_3, window_bounds = array<i64: 32, 32>}, {pipeline_mode = #tpu.pipeline_mode<synchronous>, transform_indices = @transform_4, window_bounds = array<i64: 32, 32>}, {transform_indices = @transform_5, window_bounds = array<i64: 1, 8, 32>}, {transform_indices = @transform_6, window_bounds = array<i64: 1, 8, 8>}]} {
    %c0 = arith.constant 0 : index
    %c0_0 = arith.constant 0 : index
    %c0_1 = arith.constant 0 : index
    %0 = vector.load %arg1[%c0, %c0_0, %c0_1] : memref<1x8x32xf32, #tpu.memory_space<vmem>>, vector<1x8x32xf32>
    %c0_2 = arith.constant 0 : index
    %c0_3 = arith.constant 0 : index
    %c0_4 = arith.constant 0 : index
    %1 = vector.load %arg2[%c0_2, %c0_3, %c0_4] : memref<1x8x32xf32, #tpu.memory_space<vmem>>, vector<1x8x32xf32>
    %c0_5 = arith.constant 0 : index
    %c0_6 = arith.constant 0 : index
    %2 = vector.load %arg3[%c0_5, %c0_6] : memref<32x32xf32, #tpu.memory_space<vmem>>, vector<32x32xf32>
    %c0_7 = arith.constant 0 : index
    %c0_8 = arith.constant 0 : index
    %3 = vector.load %arg4[%c0_7, %c0_8] : memref<32x32xf32, #tpu.memory_space<vmem>>, vector<32x32xf32>
    %c0_9 = arith.constant 0 : index
    %c0_10 = arith.constant 0 : index
    %4 = vector.load %arg5[%c0_9, %c0_10] : memref<32x32xf32, #tpu.memory_space<vmem>>, vector<32x32xf32>
    %5 = vector.shape_cast %0 : vector<1x8x32xf32> to vector<8x32xf32>
    %cst = arith.constant dense<0.000000e+00> : vector<8x32xf32>
    %6 = tpu.matmul %5, %2, %cst {dimension_numbers = #tpu.dot_dimension_numbers<[1], [0], [0], [1], [0, 0, 1, 1], [], []>} : vector<8x32xf32>, vector<32x32xf32>, vector<8x32xf32> -> vector<8x32xf32>
    %7 = vector.shape_cast %6 : vector<8x32xf32> to vector<1x8x32xf32>
    "tpu.trace_start"() <{level = 10 : i32, message = "btd,bsd->bts"}> : () -> ()
    %cst_11 = arith.constant dense<0.000000e+00> : vector<1x8x8xf32>
    %8 = tpu.matmul %7, %1, %cst_11 {dimension_numbers = #tpu.dot_dimension_numbers<[2], [2], [1], [1], [0, 0, 0, 1, 1, 1], [0], [0]>} : vector<1x8x32xf32>, vector<1x8x32xf32>, vector<1x8x8xf32> -> vector<1x8x8xf32>
    "tpu.trace_stop"() : () -> ()
    %cst_12 = arith.constant dense<0xFF800000> : vector<1x8xf32>
    %9 = vector.multi_reduction <maximumf>, %8, %cst_12 [2] : vector<1x8x8xf32> to vector<1x8xf32>
    %10 = vector.shape_cast %9 : vector<1x8xf32> to vector<1x8x1xf32>
    %11 = vector.broadcast %10 : vector<1x8x1xf32> to vector<1x8x8xf32>
    %12 = arith.subf %8, %11 : vector<1x8x8xf32>
    %13 = math.exp %12 : vector<1x8x8xf32>
    %cst_13 = arith.constant dense<0.000000e+00> : vector<1x8xf32>
    %14 = vector.multi_reduction <add>, %13, %cst_13 [2] : vector<1x8x8xf32> to vector<1x8xf32>
    %15 = vector.shape_cast %14 : vector<1x8xf32> to vector<1x8x1xf32>
    %16 = tpu.reciprocal %15 {approx = true} : vector<1x8x1xf32> -> vector<1x8x1xf32>
    %17 = arith.mulf %15, %16 : vector<1x8x1xf32>
    %cst_14 = arith.constant 2.000000e+00 : f32
    %18 = vector.broadcast %cst_14 : f32 to vector<1x8x1xf32>
    %19 = arith.subf %18, %17 : vector<1x8x1xf32>
    %20 = arith.mulf %16, %19 : vector<1x8x1xf32>
    %21 = vector.broadcast %20 : vector<1x8x1xf32> to vector<1x8x8xf32>
    %22 = arith.mulf %13, %21 : vector<1x8x8xf32>
    "tpu.trace_start"() <{level = 10 : i32, message = "bts,bsd->btd"}> : () -> ()
    %cst_15 = arith.constant dense<0.000000e+00> : vector<1x8x32xf32>
    %23 = tpu.matmul %22, %1, %cst_15 {dimension_numbers = #tpu.dot_dimension_numbers<[2], [1], [1], [2], [0, 0, 0, 1, 1, 2], [0], [0]>} : vector<1x8x8xf32>, vector<1x8x32xf32>, vector<1x8x32xf32> -> vector<1x8x32xf32>
    "tpu.trace_stop"() : () -> ()
    %24 = vector.shape_cast %23 : vector<1x8x32xf32> to vector<8x32xf32>
    %cst_16 = arith.constant dense<0.000000e+00> : vector<8x32xf32>
    %25 = tpu.matmul %24, %3, %cst_16 {dimension_numbers = #tpu.dot_dimension_numbers<[1], [0], [0], [1], [0, 0, 1, 1], [], []>} : vector<8x32xf32>, vector<32x32xf32>, vector<8x32xf32> -> vector<8x32xf32>
    %cst_17 = arith.constant dense<0.000000e+00> : vector<8x32xf32>
    %26 = tpu.matmul %5, %4, %cst_17 {dimension_numbers = #tpu.dot_dimension_numbers<[1], [0], [0], [1], [0, 0, 1, 1], [], []>} : vector<8x32xf32>, vector<32x32xf32>, vector<8x32xf32> -> vector<8x32xf32>
    %27 = arith.addf %25, %26 : vector<8x32xf32>
    %28 = math.tanh %27 : vector<8x32xf32>
    %29 = vector.shape_cast %28 : vector<8x32xf32> to vector<1x8x32xf32>
    %c0_18 = arith.constant 0 : index
    %c0_19 = arith.constant 0 : index
    %c0_20 = arith.constant 0 : index
    %30 = vector.load %arg6[%c0_18, %c0_19, %c0_20] : memref<1x8x32xf32, #tpu.memory_space<vmem>>, vector<1x8x32xf32>
    tpu.vector_store %arg6[%c0_18, %c0_19, %c0_20], %29 {strides = array<i32>} : memref<1x8x32xf32, #tpu.memory_space<vmem>>, vector<1x8x32xf32>,
    %c0_21 = arith.constant 0 : index
    %c0_22 = arith.constant 0 : index
    %c0_23 = arith.constant 0 : index
    %31 = vector.load %arg7[%c0_21, %c0_22, %c0_23] : memref<1x8x8xf32, #tpu.memory_space<vmem>>, vector<1x8x8xf32>
    tpu.vector_store %arg7[%c0_21, %c0_22, %c0_23], %22 {strides = array<i32>} : memref<1x8x8xf32, #tpu.memory_space<vmem>>, vector<1x8x8xf32>,
    return
  }
  func.func @transform_0(%arg0: i32) -> (i32, i32, i32) {
    %c0_i32 = arith.constant 0 : i32
    %c0_i32_0 = arith.constant 0 : i32
    %c0_i32_1 = arith.constant 0 : i32
    return %arg0, %c0_i32, %c0_i32_0 : i32, i32, i32
  }
  func.func @transform_1(%arg0: i32) -> (i32, i32, i32) {
    %c0_i32 = arith.constant 0 : i32
    %c0_i32_0 = arith.constant 0 : i32
    %c0_i32_1 = arith.constant 0 : i32
    return %arg0, %c0_i32, %c0_i32_0 : i32, i32, i32
  }
  func.func @transform_2(%arg0: i32) -> (i32, i32) {
    %c0_i32 = arith.constant 0 : i32
    %c0_i32_0 = arith.constant 0 : i32
    %c0_i32_1 = arith.constant 0 : i32
    return %c0_i32, %c0_i32_0 : i32, i32
  }
  func.func @transform_3(%arg0: i32) -> (i32, i32) {
    %c0_i32 = arith.constant 0 : i32
    %c0_i32_0 = arith.constant 0 : i32
    %c0_i32_1 = arith.constant 0 : i32
    return %c0_i32, %c0_i32_0 : i32, i32
  }
  func.func @transform_4(%arg0: i32) -> (i32, i32) {
    %c0_i32 = arith.constant 0 : i32
    %c0_i32_0 = arith.constant 0 : i32
    %c0_i32_1 = arith.constant 0 : i32
    return %c0_i32, %c0_i32_0 : i32, i32
  }
  func.func @transform_5(%arg0: i32) -> (i32, i32, i32) {
    %c0_i32 = arith.constant 0 : i32
    %c0_i32_0 = arith.constant 0 : i32
    %c0_i32_1 = arith.constant 0 : i32
    return %arg0, %c0_i32, %c0_i32_0 : i32, i32, i32
  }
  func.func @transform_6(%arg0: i32) -> (i32, i32, i32) {
    %c0_i32 = arith.constant 0 : i32
    %c0_i32_0 = arith.constant 0 : i32
    %c0_i32_1 = arith.constant 0 : i32
    return %arg0, %c0_i32, %c0_i32_0 : i32, i32, i32
  }
}

</mosaic_0001>

<bundles_post_ra>
// kernel: tpu_custom_call.1
= control target key start
LH: loop header
LB: loop body
LE: loop exit
PB: predicated region body
PF: predicated region fallthrough
CT: control target
= control target key end

     0   :  { %s1702_s0 = inlined_call_operand.hbm [shape: f32[2,8,32], index: 0, kind: input, shape index: {}]   ;;  %s1703_s1 = inlined_call_operand.hbm [shape: f32[2,8,32], index: 1, kind: input, shape index: {}]   ;;  %s1704_s2 = inlined_call_operand.hbm [shape: f32[32,32], index: 2, kind: input, shape index: {}]   ;;  %s1705_s3 = inlined_call_operand.hbm [shape: f32[32,32], index: 3, kind: input, shape index: {}]   ;;  %s1706_s4 = inlined_call_operand.hbm [shape: f32[32,32], index: 4, kind: input, shape index: {}]   ;;  %s1707_s5 = inlined_call_operand.hbm [shape: f32[2,8,32], index: 5, kind: output, shape index: {0}]   ;;  %s1708_s6 = inlined_call_operand.hbm [shape: f32[2,8,8], index: 6, kind: output, shape index: {1}]  }
   0x1   :  { %1713 = sst [smem:[#allocation20_spill]] %s1704_s2 }
   0x2   :  { %1714 = sst [smem:[#allocation21_spill]] %s1705_s3 }
   0x3   :  { %1715 = sst [smem:[#allocation22_spill]] %s1706_s4 }
   0x4   :  { %12 = vsyncpa [#allocation3], 0 }
   0x5   :  { %14 = vsyncpa [#allocation3 + $0x1], 0 }
   0x6   :  { %15 = vsyncpa [#allocation6], 0 }
   0x7   :  { %17 = vsyncpa [#allocation6 + $0x1], 0 }
   0x8   :  { %18 = vsyncpa [#allocation9], 0 }
   0x9   :  { %19 = vsyncpa [#allocation4], 0 }
   0xa   :  { %21 = vsyncpa [#allocation4 + $0x1], 0 }
   0xb   :  { %22 = vsyncpa [#allocation13], 0 }
   0xc   :  { %24 = vsyncpa [#allocation13 + $0x1], 0  ;;  %s1418_s21 = smov 0   ;;  %s1420_s22 = smov 0  }
   0xd   :  { %s1422_s23 = smov 0   ;;  %s1424_s24 = smov 0  }
   0xe LB: > { %s1439_s25 = sadd.s32 4294967295, %s1370_s24   ;;  %s941_s26 = sadd.s32 4294967294, %s1370_s24   ;;  %s1370_s24 = sphi %s1424_s24, %s1738_s24   ;;  %s1366_s23 = sphi %s1422_s23, %s1737_s23   ;;  %s1362_s22 = sphi %s1420_s22, %s1736_s22   ;;  %s1358_s21 = sphi %s1418_s21, %s1735_s21  }
   0xf   : > { %p50_p0 = scmp.ne.s32.totalorder %s1362_s22, %s1358_s21  ;;  %p1709_p1 = scmp.eq.s32.totalorder %s1439_s25, 0 }
  0x10   : > { %p169_p3 = scmp.eq.s32.totalorder %s941_s26, 1  ;;  %p942_p5 = scmp.ge.s32.totalorder %s1370_s24, 1 }
  0x11   : > { %p1448_p4 = por %p1709_p1, %p50_p0  ;;  %p202_p7 = scmp.lt.s32.totalorder %s1370_s24, 3 }
  0x12   : > { %p1453_p6 = por %p169_p3, %p50_p0  ;;  %s1372_s30 = smov [#allocation7]  }
  0x13   : > { %s1716_s27 = scalar_select %p1448_p4, 1, 0 }
  0x14   : > { %s1717_s28 = scalar_select %p1453_p6, 1, 0 }
  0x15   : > { %p1458_p8 = pnand %p942_p5, %p202_p7  ;;  %s214_s7 = sshll.u32 %s1372_s30, 4  ;;  %s215_s7 = int_to_ptr.vmem [resolvable:$true] %s214_s7 }
  0x16   : > { %s1373_s9 = smov [#allocation8]   ;;  %s1374_s11 = smov [#allocation10]  }
  0x17   : > { %s1718_s29 = scalar_select %p1458_p8, 1, 0 }
  0x18   : > { %p1053_p9 = pneg %p1458_p8  ;;  %s227_s10 = sshll.u32 %s1373_s9, 4  ;;  %s228_s10 = int_to_ptr.vmem [resolvable:$true] %s227_s10 }
  0x19   : > { %s240_s12 = sshll.u32 %s1374_s11, 4  ;;  %s1141_s13 = scalar_lea.vmem %s215_s7, 512  ;;  %s241_s12 = int_to_ptr.vmem [resolvable:$true] %s240_s12 }
  0x1a   : > { %p1467_p11 = pnand %p1053_p9, %p1709_p1  ;;  %p1142_p13 = scmp.ne.s32.totalorder %s215_s7, %s1141_s13 }
  0x1b   : > { %p1149_p5 = scmp.lt.s32.totalorder %s215_s7, %s215_s7  ;;  %p1150_p7 = scmp.lt.s32.totalorder %s1141_s13, %s1141_s13 }
  0x1c   : > { %p1132_p12 = pneg %p1467_p11 }
  0x1d   : > { %p1151_p9 = por %p1150_p7, %p1149_p5 }
  0x1e   : > { %p1144_p0 = pnand %p1142_p13, %p1132_p12 }
  0x20   : > { %p1145_p3 = pneg %p1144_p0 }
  0x22   : > { %p1152_p10 = pnand %p1151_p9, %p1145_p3 }
  0x24   : > { %1155 = shalt.err (!%p1152_p10)
}
  0x25   : > { %s1375_s14 = smov 128   ;;  %s1376_s15 = smov 8  }
  0x26   : > { %s1720_s2 = sld [smem:[#allocation20_spill]]  ;;  %s1167_s18 = scalar_lea.vmem %s228_s10, 512 }
  0x27   : > { %p1168_p1 = scmp.ne.s32.totalorder %s228_s10, %s1167_s18  ;;  %p1175_p2 = scmp.lt.s32.totalorder %s228_s10, %s228_s10 }
  0x28   : > { %p1176_p6 = scmp.lt.s32.totalorder %s1167_s18, %s1167_s18 }
  0x29   : > { %p1170_p13 = pnand %p1168_p1, %p1132_p12 }
  0x2a   : > { %p1177_p5 = por %p1176_p6, %p1175_p2 }
  0x2b   : > { %p1171_p0 = pneg %p1170_p13 }
  0x2c   : > { %1056 = dma.hbm_to_vmem [thread:$0]  (!%p1467_p11), %s1720_s2, 512, %s215_s7, [#allocation6], %s1375_s14, %s1375_s14, %s1376_s15  }
  0x2d   : > { %p1178_p3 = pnand %p1177_p5, %p1171_p0 }
  0x2f   : > { %1181 = shalt.err (!%p1178_p3)
}
  0x30   : > { %s1721_s3 = sld [smem:[#allocation21_spill]]  ;;  %s1193_s26 = scalar_lea.vmem %s241_s12, 512 }
  0x31   : > { %p1194_p10 = scmp.ne.s32.totalorder %s241_s12, %s1193_s26  ;;  %p1201_p9 = scmp.lt.s32.totalorder %s241_s12, %s241_s12 }
  0x32   : > { %p1202_p13 = scmp.lt.s32.totalorder %s1193_s26, %s1193_s26 }
  0x33   : > { %p1196_p7 = pnand %p1194_p10, %p1132_p12 }
  0x34   : > { %p1203_p4 = por %p1202_p13, %p1201_p9 }
  0x35   : > { %p1197_p1 = pneg %p1196_p7 }
  0x36   : > { %1059 = dma.hbm_to_vmem [thread:$0]  (!%p1467_p11), %s1721_s3, 512, %s228_s10, [#allocation9], %s1375_s14, %s1375_s14, %s1376_s15  }
  0x37   : > { %p1204_p2 = pnand %p1203_p4, %p1197_p1 }
  0x39   : > { %1207 = shalt.err (!%p1204_p2)
}
  0x3a   : > { %s1722_s4 = sld [smem:[#allocation22_spill]]  ;;  %s1498_s9 = sadd.s32 1, %s1370_s24  }
  0x3b   : > { %s34_s10 = ssub.s32 %s1370_s24, %s1498_s9  ;;  %s37_s8 = sadd.s32 1, %s1366_s23 }
  0x3c   : > { %p35_p4 = scmp.eq.s32.totalorder %s34_s10, 0  ;;  %p44_p6 = scmp.ne.s32.totalorder %s1366_s23, %s1362_s22 }
  0x3d   : > { %p45_p12 = scmp.eq.s32.totalorder %s1370_s24, 0  ;;  %p1080_p0 = scmp.lt.s32.totalorder %s1370_s24, 2 }
  0x3e   : > { %s1508_s11 = scalar_select %p35_p4, %s1366_s23, %s37_s8  }
  0x3f   : > { %p46_p5 = por %p45_p12, %p44_p6  ;;  %p1723_p3 = scmp.eq.s32.totalorder %s1439_s25, 1 }
  0x40   : > { %1062 = dma.hbm_to_vmem [thread:$0]  (!%p1467_p11), %s1722_s4, 512, %s241_s12, [#allocation9], %s1375_s14, %s1375_s14, %s1376_s15  }
  0x41   : > { %p1512_p10 = por %p1723_p3, %p44_p6  ;;  %s254_s16 = sand.u32 1, %s1366_s23  }
  0x42   : > { %s948_s17 = sshll.u32 %s1370_s24, 7  ;;  %s1518_s12 = sshll.u32 %s254_s16, 3 }
  0x43   : > { %s1724_s13 = scalar_select %p1512_p10, 1, 0 }
  0x44   : > { %s1523_s18 = scalar_lea.hbm %s1702_s0, %s948_s17  ;;  %s258_s19 = scalar_lea.vmem [#allocation2], %s1518_s12 }
  0x45   : > { %s265_s20 = sshll.u32 %s258_s19, 4  ;;  %p1526_p11 = pnand %p1080_p0, %p46_p5  ;;  %s266_s20 = int_to_ptr.vmem [resolvable:$true] %s265_s20 }
  0x46   : > { %s1533_s10 = scalar_lea.hbm %s1703_s1, %s948_s17  ;;  %s255_s8 = scalar_lea.sflag [#allocation3], %s254_s16 }
  0x47   : > { %s1208_s14 = scalar_lea.hbm %s1523_s18, 128  ;;  %p1210_p1 = pneg %p1526_p11 }
  0x48   : > { %p1209_p7 = scmp.ne.s32.totalorder %s1523_s18, %s1208_s14  ;;  %s1213_s2 = scalar_lea.hbm %s1702_s0, 256 }
  0x49   : > { %p1214_p2 = scmp.lt.s32.totalorder %s1523_s18, %s1702_s0  ;;  %p1215_p4 = scmp.lt.s32.totalorder %s1213_s2, %s1208_s14 }
  0x4a   : > { %p1211_p9 = pnand %p1210_p1, %p1209_p7 }
  0x4b   : > { %p1216_p6 = por %p1215_p4, %p1214_p2 }
  0x4c   : > { %p1212_p13 = pneg %p1211_p9 }
  0x4e   : > { %p1217_p12 = pnand %p1216_p6, %p1212_p13 }
  0x50   : > { %1220 = shalt.err (!%p1217_p12)
}
  0x51   : > { %s1221_s16 = scalar_lea.vmem %s266_s20, 128  ;;  %s1377_s17 = smov [#allocation2]  }
  0x52   : > { %p1222_p0 = scmp.ne.s32.totalorder %s266_s20, %s1221_s16  ;;  %s1226_s30 = sshll.u32 %s1377_s17, 4  ;;  %s1227_s30 = int_to_ptr.vmem [resolvable:$false] %s1226_s30 }
  0x53   : > { %s1228_s7 = scalar_lea.vmem %s1227_s30, 256  ;;  %p1229_p7 = scmp.lt.s32.totalorder %s266_s20, %s1227_s30 }
  0x54   : > { %p1224_p5 = pnand %p1222_p0, %p1210_p1  ;;  %p1230_p9 = scmp.lt.s32.totalorder %s1228_s7, %s1221_s16 }
  0x56   : > { %p1225_p3 = pneg %p1224_p5  ;;  %p1231_p10 = por %p1230_p9, %p1229_p7 }
  0x58   : > { %p1232_p8 = pnand %p1231_p10, %p1225_p3 }
  0x5a   : > { %1235 = shalt.err (!%p1232_p8)
}
  0x5b   : > { %1066 = dma.hbm_to_vmem [thread:$0]  (!%p1526_p11), %s1523_s18, 128, %s266_s20, %s255_s8  }
  0x5c   : > { %s272_s2 = sand.u32 1, %s1370_s24   ;;  %s276_s3 = scalar_lea.vmem [#allocation5], %s1518_s12 }
  0x5d   : > { %s283_s4 = sshll.u32 %s276_s3, 4  ;;  %s273_s14 = scalar_lea.sflag [#allocation6], %s272_s2  ;;  %s284_s4 = int_to_ptr.vmem [resolvable:$true] %s283_s4 }
  0x5e   : > { %s1236_s15 = scalar_lea.hbm %s1533_s10, 128  ;;  %s1241_s17 = scalar_lea.hbm %s1703_s1, 256 }
  0x5f   : > { %p1237_p13 = scmp.ne.s32.totalorder %s1533_s10, %s1236_s15  ;;  %p1242_p2 = scmp.lt.s32.totalorder %s1533_s10, %s1703_s1 }
  0x60   : > { %p1243_p4 = scmp.lt.s32.totalorder %s1241_s17, %s1236_s15 }
  0x61   : > { %p1239_p8 = pnand %p1237_p13, %p1210_p1 }
  0x62   : > { %p1244_p6 = por %p1243_p4, %p1242_p2 }
  0x63   : > { %p1240_p10 = pneg %p1239_p8 }
  0x65   : > { %p1245_p12 = pnand %p1244_p6, %p1240_p10 }
  0x67   : > { %1248 = shalt.err (!%p1245_p12)
}
  0x68   : > { %s1249_s12 = scalar_lea.vmem %s284_s4, 128  ;;  %s1378_s18 = smov [#allocation5]  }
  0x69   : > { %p1250_p0 = scmp.ne.s32.totalorder %s284_s4, %s1249_s12  ;;  %s1254_s20 = sshll.u32 %s1378_s18, 4  ;;  %s1255_s20 = int_to_ptr.vmem [resolvable:$false] %s1254_s20 }
  0x6a   : > { %s1256_s8 = scalar_lea.vmem %s1255_s20, 256  ;;  %p1257_p7 = scmp.lt.s32.totalorder %s284_s4, %s1255_s20 }
  0x6b   : > { %p1252_p5 = pnand %p1250_p0, %p1210_p1  ;;  %p1258_p9 = scmp.lt.s32.totalorder %s1256_s8, %s1249_s12 }
  0x6d   : > { %p1253_p3 = pneg %p1252_p5  ;;  %p1259_p13 = por %p1258_p9, %p1257_p7 }
  0x6f   : > { %p1260_p8 = pnand %p1259_p13, %p1253_p3 }
  0x71   : > { %1263 = shalt.err (!%p1260_p8)
}
  0x72   : > { %1069 = dma.hbm_to_vmem [thread:$0]  (!%p1526_p11), %s1533_s10, 128, %s284_s4, %s273_s14  }
  0x73   : > { %p1726_p10 = scmp.ne.s32.totalorder %s1718_s29, 0 }
  0x74   : > { %s1578_s2 = sand.u32 (!%p1726_p10), 1, %s1362_s22   ;;  %p1727_p1 = scmp.ne.s32.totalorder (!%p1726_p10), %s1716_s27, 0 }
  0x75   : > { %292 = sbr.rel (%p1726_p10) target bundleno = 1262 (0x4ee), region = 40  ;;  %s1581_s3 = sshll.u32 (!%p1726_p10), %s1578_s2, 3 }
  0x76   : > { %s295_s15 = scalar_lea.sflag (!%p1726_p10), [#allocation3], %s1578_s2  ;;  %s298_s19 = scalar_lea.vmem (!%p1726_p10), [#allocation2], %s1581_s3 }
  0x7a   : > { %1333 = dma.done.wait (%p1727_p1), %s295_s15, 128  }
  0x7b   : > { %1335 = vsyncadd (%p1727_p1), %s295_s15, 4294967168  ;;  %s303_s29 = sand.u32 1, %s1439_s25   ;;  %s307_s10 = scalar_lea.vmem [#allocation5], %s1581_s3 }
  0x7c   : > { %s304_s26 = scalar_lea.sflag [#allocation6], %s303_s29 }
  0x7d   : > { %1337 = dma.done.wait (%p1727_p1), %s304_s26, 128  }
  0x7e   : > { %1339 = vsyncadd (%p1727_p1), %s304_s26, 4294967168  ;;  %p1728_p11 = scmp.eq.s32.totalorder %s1439_s25, 0 }
  0x80   : > { %1341 = dma.done.wait (%p1728_p11), [#allocation6], 512   ;;  %p1729_p2 = pmov %p1728_p11 }
  0x82   : > { %1343 = vsyncadd (%p1729_p2), [#allocation6], 4294966784  ;;  %p1730_p4 = pmov %p1729_p2 }
  0x83   : > { %p1731_p6 = pmov %p1729_p2 }
  0x84   : > { %1345 = dma.done.wait (%p1730_p4), [#allocation9], 1024  }
  0x85   : > { %1347 = vsyncadd (%p1731_p6), [#allocation9], 4294966272  ;;  %v1379_v0 = vmov 0.0   ;;  %vm1380_vm0 = vmmov 0   ;;  %v363_v1 = vld [vmem:[#allocation7 + $0x18] sm:$0xff]  ;;  %v362_v2 = vld [vmem:[#allocation7 + $0x10] sm:$0xff] }
  0x86   : > { %990 = vmatprep.subr.mxu0 %v1379_v0  ;;  %998 = vmatprep.mubr.msk.f32.mxu0 %vm1380_vm0, %v1379_v0  ;;  %vm372_vm1 = vcmask 261120   ;;  %v359_v3 = vld [vmem:[%s307_s10] sm:$0xff]  ;;  %v361_v4 = vld [vmem:[#allocation7 + $0x8] sm:$0xff]  ;;  %v360_v5 = vld [vmem:[#allocation7] sm:$0xff]  ;;  %vm522_vm2 = vcmask 64512   ;;  %s357_s27 = scalar_lea.vmem [#allocation12], %s1581_s3 }
  0x87   : > { %1001 = vmatprep.subr.mxu1 %v1379_v0  ;;  %1003 = vmatprep.mubr.msk.f32.mxu1 %vm1380_vm0, %v1379_v0  ;;  %v358_v6 = vld [vmem:[%s298_s19] sm:$0xff]  ;;  %v371_v17 = vld [vmem:[#allocation10 + $0x18] sm:$0xff]  ;;  %v370_v18 = vld [vmem:[#allocation10 + $0x10] sm:$0xff]  ;;  %s967_s4 = sshll.u32 %s1439_s25, 7  ;;  %s788_s30 = sshll.u32 %s357_s27, 4  ;;  %s789_s30 = int_to_ptr.vmem [resolvable:$true] %s788_s30 }
  0x88   : > { %991 = vmatpush3.msra.mxu0 %v363_v1  ;;  %1002 = vmatpush3.xpose.msk.msra.mxu1 %vm372_vm1, %v359_v3  ;;  %v369_v19 = vld [vmem:[#allocation10 + $0x8] sm:$0xff]  ;;  %v368_v20 = vld [vmem:[#allocation10] sm:$0xff]  ;;  %v367_v27 = vld [vmem:[#allocation8 + $0x18] sm:$0xff]  ;;  %s786_s17 = scalar_lea.hbm %s1708_s6, %s967_s4  ;;  %s762_s7 = scalar_lea.sflag [#allocation13], %s1578_s2 }
  0x89   : > { %992 = vmatprep.subr.mxu0 %v1379_v0  ;;  %1006 = vmatprep.subr.mxu1 %v1379_v0  ;;  %v366_v28 = vld [vmem:[#allocation8 + $0x10] sm:$0xff]  ;;  %v365_v29 = vld [vmem:[#allocation8 + $0x8] sm:$0xff]  ;;  %v364_v30 = vld [vmem:[#allocation8] sm:$0xff]  ;;  %s1264_s12 = scalar_lea.vmem %s789_s30, 128  ;;  %p1732_p0 = scmp.ne.s32.totalorder %s1724_s13, 0 }
  0x8a   : > { %993 = vmatpush3.msra.mxu0 %v362_v2  ;;  %p1265_p12 = scmp.ne.s32.totalorder %s789_s30, %s1264_s12  ;;  %s1381_s18 = smov [#allocation12]  }
  0x8b   : > { %994 = vmatprep.subr.mxu0 %v1379_v0  ;;  %s1268_s20 = sshll.u32 %s1381_s18, 4  ;;  %s1269_s20 = int_to_ptr.vmem [resolvable:$false] %s1268_s20 }
  0x8c   : > { %995 = vmatpush3.msra.mxu0 %v361_v4  ;;  %p1266_p5 = pnand %p1265_p12, %p1732_p0  ;;  %s1270_s8 = scalar_lea.vmem %s1269_s20, 256 }
  0x8d   : > { %996 = vmatprep.subr.mxu0 %v1379_v0  ;;  %p1271_p7 = scmp.lt.s32.totalorder %s789_s30, %s1269_s20  ;;  %p1272_p9 = scmp.lt.s32.totalorder %s1270_s8, %s1264_s12 }
  0x8e   : > { %997 = vmatpush3.msra.mxu0 %v360_v5  ;;  %p1267_p3 = pneg %p1266_p5 }
  0x8f   : > { %999 = vmatmul.mubr.msk.f32.vlgmr.msra.gmra.mxu0 %vm372_vm1, %v358_v6  ;;  %1011 = vmatprep.subr.mxu0 %v1379_v0  ;;  %p1273_p13 = por %p1272_p9, %p1271_p7 }
  0x90   : > { %1019 = vmatprep.mubr.msk.f32.mxu0 %vm1380_vm0, %v1379_v0  ;;  %1012 = vmatpush3.msra.mxu0 %v371_v17 }
  0x91   : > { %1013 = vmatprep.subr.mxu0 %v1379_v0  ;;  %p1274_p8 = pnand %p1273_p13, %p1267_p3 }
  0x92   : > { %1014 = vmatpush3.msra.mxu0 %v370_v18 }
  0x93   : > { %1015 = vmatprep.subr.mxu0 %v1379_v0 }
  0x94   : > { %1016 = vmatpush3.msra.mxu0 %v369_v19 }
  0x95   : > { %1017 = vmatprep.subr.mxu0 %v1379_v0 }
  0x96   : > { %1018 = vmatpush3.msra.mxu0 %v368_v20 }
  0x97   : > { %1020 = vmatmul.mubr.msk.f32.vlgmr.msra.gmra.mxu0 %vm372_vm1, %v358_v6 }
 0x14f   : > { %v442_v7 = vpop.f32.mrf.mxu0 }
 0x150   : > { %1004 = vmatmul.mubr.msk.f32.vlgmr.msra.gmra.mxu1 %vm372_vm1, %v442_v7 }
 0x151   : > { %v1000_v8 = vpop.f32.mrf.mxu0  ;;  %1007 = vmatpush3.msra.mxu1 %v359_v3  ;;  %1008 = vmatprep.mubr.msk.f32.mxu1 %vm1380_vm0, %v1379_v0 }
 0x152   : > { %1022 = vmatprep.subr.mxu1 %v1379_v0 }
 0x157   : > { %v676_v31 = vpop.f32.mrf.mxu0 }
 0x159   : > { %v1021_v32 = vpop.f32.mrf.mxu0 }
 0x210   : > { %v518_v9 = vpop.f32.mrf.mxu1 }
 0x211   : > { %v523_v10 = vsel %vm522_vm2, %v518_v9, -inf }
 0x212   : > { %524 = vmax.xlane.f32.xlu0 %v523_v10  ;;  %v1005_v11 = vpop.f32.mrf.mxu1 }
 0x29b   : > { %v525_v12 = vpop.xlane.xlu0 %524 }
 0x29c   : > { %v526_v13 = vsub.f32 %v518_v9, %v525_v12 }
 0x29e   : > { %v527_v14 = vmul.f32 1.442695, %v526_v13 }
 0x2a0   : > { %1124 = vpow2.f32 %v527_v14 }
 0x2ad   : > { %v1125_v15 = vpop.eup %1124 }
 0x2ae   : > { %v529_v16 = vsel %vm522_vm2, %v1125_v15, 0.0 }
 0x2af   : > { %530 = vadd.xlane.f32.xlu0 %v529_v16 }
 0x338   : > { %v531_v21 = vpop.xlane.xlu0 %530 }
 0x339   : > { %1126 = vrcp.f32 %v531_v21 }
 0x346   : > { %v1127_v22 = vpop.eup %1126 }
 0x347   : > { %v533_v23 = vmul.f32 %v1127_v22, %v531_v21 }
 0x349   : > { %v534_v24 = vsub.f32 2.0, %v533_v23 }
 0x34b   : > { %v535_v25 = vmul.f32 %v1127_v22, %v534_v24 }
 0x34d   : > { %v536_v26 = vmul.f32 %v1125_v15, %v535_v25 }
 0x34f   : > { %1009 = vmatmul.mubr.msk.f32.vlgmr.msra.gmra.mxu1 %vm522_vm2, %v536_v26  ;;  %755 = vst.msk [vmem:[%s357_s27] sm:$0xff] %vm522_vm2, %v536_v26 }
 0x350   : > { %1023 = vmatpush3.msra.mxu1 %v367_v27  ;;  %1030 = vmatprep.mubr.msk.f32.mxu1 %vm1380_vm0, %v1379_v0 }
 0x351   : > { %1024 = vmatprep.subr.mxu1 %v1379_v0 }
 0x352   : > { %1025 = vmatpush3.msra.mxu1 %v366_v28 }
 0x353   : > { %1026 = vmatprep.subr.mxu1 %v1379_v0 }
 0x354   : > { %1027 = vmatpush3.msra.mxu1 %v365_v29 }
 0x355   : > { %1028 = vmatprep.subr.mxu1 %v1379_v0 }
 0x356   : > { %1029 = vmatpush3.msra.mxu1 %v364_v30 }
 0x40f   : > { %v606_v33 = vpop.f32.mrf.mxu1 }
 0x410   : > { %1031 = vmatmul.mubr.msk.f32.vlgmr.msra.gmra.mxu1 %vm372_vm1, %v606_v33 }
 0x411   : > { %v1010_v34 = vpop.f32.mrf.mxu1 }
 0x412   : > { %1277 = shalt.err (!%p1274_p8)
}
 0x413   : > { %s1278_s15 = scalar_lea.hbm %s786_s17, 128  ;;  %s1282_s26 = scalar_lea.hbm %s1708_s6, 256 }
 0x414   : > { %p1279_p10 = scmp.ne.s32.totalorder %s786_s17, %s1278_s15  ;;  %p1283_p2 = scmp.lt.s32.totalorder %s786_s17, %s1708_s6 }
 0x415   : > { %p1284_p4 = scmp.lt.s32.totalorder %s1282_s26, %s1278_s15 }
 0x416   : > { %p1280_p1 = pnand %p1279_p10, %p1732_p0 }
 0x417   : > { %p1285_p6 = por %p1284_p4, %p1283_p2 }
 0x418   : > { %p1281_p11 = pneg %p1280_p1 }
 0x41a   : > { %p1286_p12 = pnand %p1285_p6, %p1281_p11 }
 0x41c   : > { %1289 = shalt.err (!%p1286_p12)
}
 0x41d   : > { %1050 = dma.vmem_to_hbm [thread:$0]  (%p1732_p0), %s789_s30, 128, %s786_s17, %s762_s7  }
 0x41e   : > { %s350_s14 = scalar_lea.vmem [#allocation11], %s1581_s3  ;;  %s1664_s20 = scalar_lea.hbm %s1707_s5, %s967_s4 }
 0x41f   : > { %s775_s16 = sshll.u32 %s350_s14, 4  ;;  %s757_s8 = scalar_lea.sflag [#allocation4], %s1578_s2  ;;  %s776_s16 = int_to_ptr.vmem [resolvable:$true] %s775_s16 }
 0x420   : > { %s1290_s15 = scalar_lea.vmem %s776_s16, 128  ;;  %s1382_s17 = smov [#allocation11]  }
 0x421   : > { %p1291_p5 = scmp.ne.s32.totalorder %s776_s16, %s1290_s15  ;;  %s1294_s30 = sshll.u32 %s1382_s17, 4  ;;  %s1295_s30 = int_to_ptr.vmem [resolvable:$false] %s1294_s30 }
 0x422   : > { %s1296_s3 = scalar_lea.vmem %s1295_s30, 256  ;;  %p1297_p9 = scmp.lt.s32.totalorder %s776_s16, %s1295_s30 }
 0x423   : > { %p1292_p3 = pnand %p1291_p5, %p1732_p0  ;;  %p1298_p13 = scmp.lt.s32.totalorder %s1296_s3, %s1290_s15 }
 0x425   : > { %p1293_p7 = pneg %p1292_p3  ;;  %p1299_p8 = por %p1298_p13, %p1297_p9 }
 0x427   : > { %p1300_p10 = pnand %p1299_p8, %p1293_p7 }
 0x4d0   : > { %v749_v35 = vpop.f32.mrf.mxu1 }
 0x4d1   : > { %v750_v36 = vadd.f32 %v749_v35, %v676_v31 }
 0x4d2   : > { %v1032_v37 = vpop.f32.mrf.mxu1 }
 0x4d3   : > { %1128 = vtanh.f32 %v750_v36 }
 0x4e0   : > { %v1129_v38 = vpop.eup %1128 }
 0x4e1   : > { %754 = vst.msk [vmem:[%s350_s14] sm:$0xff] %vm372_vm1, %v1129_v38 }
 0x4e2   : > { %1303 = shalt.err (!%p1300_p10)
}
 0x4e3   : > { %s1304_s25 = scalar_lea.hbm %s1664_s20, 128  ;;  %s1308_s7 = scalar_lea.hbm %s1707_s5, 256 }
 0x4e4   : > { %p1305_p1 = scmp.ne.s32.totalorder %s1664_s20, %s1304_s25  ;;  %p1309_p4 = scmp.lt.s32.totalorder %s1664_s20, %s1707_s5 }
 0x4e5   : > { %p1310_p6 = scmp.lt.s32.totalorder %s1308_s7, %s1304_s25 }
 0x4e6   : > { %p1306_p11 = pnand %p1305_p1, %p1732_p0 }
 0x4e7   : > { %p1311_p12 = por %p1310_p6, %p1309_p4 }
 0x4e8   : > { %p1307_p2 = pneg %p1306_p11 }
 0x4ea   : > { %p1312_p5 = pnand %p1311_p12, %p1307_p2 }
 0x4ec   : > { %1315 = shalt.err (!%p1312_p5)
}
 0x4ed   : > { %1049 = dma.vmem_to_hbm [thread:$0]  (%p1732_p0), %s776_s16, 128, %s1664_s20, %s757_s8  }
 0x4ee PF: > { %s800_s26 = sand.u32 1, %s1358_s21   ;;  %p1733_p3 = scmp.ne.s32.totalorder %s1717_s28, 0 }
 0x4ef   : > { %p1734_p7 = scmp.ge.s32.totalorder %s1370_s24, 2  ;;  %s801_s10 = scalar_lea.sflag [#allocation4], %s800_s26 }
 0x4f1   : > { %p1071_p9 = pnand %p1734_p7, %p1733_p3 }
 0x4f3   : > { %p1072_p13 = pneg %p1071_p9 }
 0x4f5   : > { %1349 = dma.done.wait (%p1072_p13), %s801_s10, 128  }
 0x4f6   : > { %1351 = vsyncadd (%p1072_p13), %s801_s10, 4294967168  ;;  %s810_s27 = scalar_lea.sflag [#allocation13], %s800_s26 }
 0x4f7   : > { %1353 = dma.done.wait (%p1072_p13), %s810_s27, 128  }
 0x4f8   : > { %1355 = vsyncadd (%p1072_p13), %s810_s27, 4294967168  ;;  %p27_p0 = scmp.ge.s32.totalorder %s1498_s9, 4   ;;  %s1735_s21 = smov %s1362_s22 }
 0x4f9   : > { %s1736_s22 = smov %s1366_s23  ;;  %s1737_s23 = smov %s1508_s11 }
 0x4fa   : > { %s1738_s24 = smov %s1498_s9  ;;  %29 = sbr.rel (!%p27_p0) target bundleno = 14 (0xe), region = 127 }
 0x4ff   :  { %815 = vsyncpa [#allocation3], 1 }
 0x500   :  { %817 = vsyncpa [#allocation3 + $0x1], 1 }
 0x501   :  { %818 = vsyncpa [#allocation6], 1 }
 0x502   :  { %820 = vsyncpa [#allocation6 + $0x1], 1 }
 0x503   :  { %821 = vsyncpa [#allocation9], 1 }
 0x504   :  { %822 = vsyncpa [#allocation4], 1 }
 0x505   :  { %824 = vsyncpa [#allocation4 + $0x1], 1 }
 0x506   :  { %825 = vsyncpa [#allocation13], 1 }
 0x507   :  { %827 = vsyncpa [#allocation13 + $0x1], 1 }

</bundles_post_ra>
